<compile_context>
chip_gen: v7x
topology: tpu7x:2x2x1
jax: 0.10.0
libtpu: 0.0.40
codegen_flags: <defaults>
</compile_context>

<pallas_src>
import jax
import jax.numpy as jnp
from jax import lax
from jax.experimental import pallas as pl
from jax.experimental.pallas import tpu as pltpu


def _round_up(x: int, m: int) -> int:
    return ((x + m - 1) // m) * m


def _beta_head_kernel(scalars_ref, x_ref, wvec_ref, ppl_ref, out_ref):
    # scalars_ref (SMEM, shape (3,)): [w_param, linear_bias, epsilon]
    w_param = scalars_ref[0]
    bias = scalars_ref[1]
    eps = scalars_ref[2]

    x = x_ref[...]        # (tb, D), native activation dtype
    wv = wvec_ref[...]    # (1, D),  same dtype as x (resident across the grid)

    # Linear(D -> 1) for the whole tile in one MXU op:
    #   (1, D) . (tb, D)^T -> (1, tb)   lane-dense result, f32 accumulation.
    # TODO(synk): verify with pl.lower_as_mlir / bundle dump that Mosaic does
    # not materialize an XLU relayout/transpose of the big (tb, D) operand for
    # this rhs-transposed contraction; if it does, switch to the wrapper-side
    # (B*D//128, 128) reshape + (128, D//32*4) block-diagonal packed-weight
    # formulation from the perf review (also removes the 4x VMEM lane padding).
    nn_out = lax.dot_general(
        wv, x,
        dimension_numbers=(((1,), (1,)), ((), ())),
        preferred_element_type=jnp.float32,
    ) + bias                                            # (1, tb) f32

    fx = 1.0 + eps * jnp.tanh(nn_out)                   # (1, tb)
    out_ref[...] = (jnp.abs(w_param) * ppl_ref[...] * fx).astype(out_ref.dtype)


def beta_head_forward(context_embedding, ppl, weight, bias, w_param, epsilon,
                      *, block_b: int = 16384, min_pallas_batch: int = 2048):
    """context_embedding: (B, D), ppl: (B,) -> beta: (B,) float32.

    Activations are used in their native dtype (feed bf16 to halve HBM traffic
    of this bandwidth-bound kernel).  NOTE: the linear weight is cast to the
    activation dtype, so a bf16 activation pipeline quantizes the weight to
    bf16 (accumulation stays f32); keep f32 activations if exact f32 parity
    with the PyTorch reference is required.
    """
    B, D = context_embedding.shape
    assert ppl.shape == (B,)

    x = context_embedding                       # keep native dtype (no up-cast)
    wvec = weight.reshape(1, D).astype(x.dtype)

    if B < min_pallas_batch:
        # Tiny batch: kernel launch + per-grid-step overhead dwarfs the work;
        # plain jnp lets XLA fuse this into surrounding ops.
        nn_out = jnp.einsum("bd,d->b", x.astype(jnp.float32),
                            wvec[0].astype(jnp.float32)) + bias
        fx = 1.0 + epsilon * jnp.tanh(nn_out)
        return jnp.abs(w_param) * ppl.astype(jnp.float32) * fx

    itemsize = x.dtype.itemsize

    # Batch tile: multiple of 128 (lane-dense ppl/beta blocks, bf16 sublane
    # packing), capped both by block_b and by a conservative scoped-VMEM
    # budget for the *lane-padded*, double-buffered x blocks (a (tb, 32)
    # block occupies tb x 128 lanes in VMEM).
    x_vmem_budget = 32 << 20
    tb_cap = (x_vmem_budget // (2 * 128 * itemsize)) // 128 * 128
    tb = min(_round_up(block_b, 128), _round_up(B, 128), tb_cap)

    ppl_row = ppl.astype(jnp.float32).reshape(1, B)     # free metadata reshape
    scalars = jnp.array([w_param, bias, epsilon], dtype=jnp.float32)

    # Scoped-VMEM request from the padded footprints (double-buffered):
    #   x:   2 * tb * 128 lanes * itemsize
    #   ppl: (1, tb) f32, sublane-padded to 8 rows
    #   out: (1, tb) f32, sublane-padded to 8 rows
    vmem_bytes = int(2 * tb * 128 * itemsize
                     + 2 * 8 * tb * 4
                     + 2 * 8 * tb * 4
                     + (1 << 20))                       # wvec, scalars, slack

    cost = pl.CostEstimate(
        flops=2 * B * D,
        transcendentals=B,
        bytes_accessed=B * D * itemsize + 2 * B * 4 + D * itemsize,
    )

    grid = (pl.cdiv(B, tb),)                            # no padding of inputs
    out = pl.pallas_call(
        _beta_head_kernel,
        out_shape=jax.ShapeDtypeStruct((1, B), jnp.float32),
        grid=grid,
        in_specs=[
            pl.BlockSpec(memory_space=pltpu.MemorySpace.SMEM),   # scalars (SMEM)
            pl.BlockSpec((tb, D), lambda i: (i, 0)),             # x batch tile
            pl.BlockSpec((1, D), lambda i: (0, 0)),              # weight vec, resident
            pl.BlockSpec((1, tb), lambda i: (0, i)),             # ppl tile (lane-dense)
        ],
        out_specs=pl.BlockSpec((1, tb), lambda i: (0, i)),       # beta tile (lane-dense)
        compiler_params=pltpu.CompilerParams(
            dimension_semantics=("parallel",),        # v7x: shard batch over 2 TCs
            vmem_limit_bytes=vmem_bytes,
        ),
        cost_estimate=cost,
    )(scalars, x, wvec, ppl_row)

    return out.reshape(B)


if __name__ == "__main__":
    # Small shapes consistent with the module: batch=8, input_dim=32.
    B, D = 8, 32
    epsilon = 0.1
    init_weight = 1.0

    key = jax.random.PRNGKey(0)
    k_x, k_ppl, k_w, k_b = jax.random.split(key, 4)

    # Deterministic parameter init (mirrors nn.Linear's uniform(-1/sqrt(D), 1/sqrt(D))).
    bound = 1.0 / (D ** 0.5)
    lin_weight = jax.random.uniform(k_w, (1, D), jnp.float32, -bound, bound)
    lin_bias = jax.random.uniform(k_b, (), jnp.float32, -bound, bound)
    w_param = jnp.float32(init_weight)

    # bf16 activations: x is >95% of HBM traffic of this bandwidth-bound
    # kernel; the MXU still accumulates in f32 inside the kernel.
    x = jax.random.normal(k_x, (B, D), jnp.float32).astype(jnp.bfloat16)
    ppl = jax.random.uniform(k_ppl, (B,), jnp.float32, 1.0, 20.0)  # perplexity > 0

    # Force the Pallas path for this tiny demo batch (the default wrapper
    # routes B < min_pallas_batch to the fused plain-jnp fallback).
    beta = beta_head_forward(x, ppl, lin_weight, lin_bias, w_param, epsilon,
                             min_pallas_batch=0)
    beta = jax.block_until_ready(beta)

    # Pure-JAX reference (same bf16 quantization of x and the linear weight).
    x32 = x.astype(jnp.float32)
    w32 = lin_weight.astype(jnp.bfloat16).astype(jnp.float32)
    nn_out_ref = (x32 @ w32.T).reshape(B) + lin_bias
    beta_ref = jnp.abs(w_param) * ppl * (1.0 + epsilon * jnp.tanh(nn_out_ref))
    assert beta.shape == (B,)
    assert jnp.allclose(beta, beta_ref, atol=1e-4, rtol=1e-4), (beta, beta_ref)

    # Also exercise the small-batch fallback path (plain jnp, default routing).
    beta_fb = jax.block_until_ready(
        beta_head_forward(x, ppl, lin_weight, lin_bias, w_param, epsilon))
    assert jnp.allclose(beta_fb, beta_ref, atol=1e-4, rtol=1e-4), (beta_fb, beta_ref)

    print("KERNEL_OK")
</pallas_src>

<mosaic_0001>
module attributes {stable_mosaic.version = 11 : i64} {
  func.func @_beta_head_kernel(%arg0: i32, %arg1: memref<3xf32, #tpu.memory_space<smem>>, %arg2: memref<128x32xbf16, #tpu.memory_space<vmem>>, %arg3: memref<1x32xbf16, #tpu.memory_space<vmem>>, %arg4: memref<1x128xf32, #tpu.memory_space<vmem>>, %arg5: memref<1x128xf32, #tpu.memory_space<vmem>>) attributes {dimension_semantics = [#tpu.dimension_semantics<parallel>], iteration_bounds = array<i64: 1>, scalar_prefetch = 0 : i64, scratch_operands = 0 : i64, tpu.core_type = #tpu.core_type<tc>, window_params = [{transform_indices = @transform_0, window_bounds = array<i64: 3>}, {transform_indices = @transform_1, window_bounds = array<i64: 128, 32>}, {pipeline_mode = #tpu.pipeline_mode<synchronous>, transform_indices = @transform_2, window_bounds = array<i64: 1, 32>}, {transform_indices = @transform_3, window_bounds = array<i64: 1, 128>}, {transform_indices = @transform_4, window_bounds = array<i64: 1, 128>}]} {
    %c0 = arith.constant 0 : index
    %0 = memref.load %arg1[%c0] : memref<3xf32, #tpu.memory_space<smem>>
    %c1 = arith.constant 1 : index
    %1 = memref.load %arg1[%c1] : memref<3xf32, #tpu.memory_space<smem>>
    %c2 = arith.constant 2 : index
    %2 = memref.load %arg1[%c2] : memref<3xf32, #tpu.memory_space<smem>>
    %c0_0 = arith.constant 0 : index
    %c0_1 = arith.constant 0 : index
    %3 = vector.load %arg2[%c0_0, %c0_1] : memref<128x32xbf16, #tpu.memory_space<vmem>>, vector<128x32xbf16>
    %c0_2 = arith.constant 0 : index
    %c0_3 = arith.constant 0 : index
    %4 = vector.load %arg3[%c0_2, %c0_3] : memref<1x32xbf16, #tpu.memory_space<vmem>>, vector<1x32xbf16>
    %cst = arith.constant dense<0.000000e+00> : vector<1x128xf32>
    %5 = tpu.matmul %4, %3, %cst {dimension_numbers = #tpu.dot_dimension_numbers<[1], [1], [0], [0], [0, 0, 1, 0], [], []>} : vector<1x32xbf16>, vector<128x32xbf16>, vector<1x128xf32> -> vector<1x128xf32>
    %6 = vector.broadcast %1 : f32 to vector<1x128xf32>
    %7 = arith.addf %5, %6 : vector<1x128xf32>
    %8 = math.tanh %7 : vector<1x128xf32>
    %9 = vector.broadcast %2 : f32 to vector<1x128xf32>
    %10 = arith.mulf %9, %8 : vector<1x128xf32>
    %cst_4 = arith.constant 1.000000e+00 : f32
    %11 = vector.broadcast %cst_4 : f32 to vector<1x128xf32>
    %12 = arith.addf %11, %10 : vector<1x128xf32>
    %13 = math.absf %0 : f32
    %c0_5 = arith.constant 0 : index
    %c0_6 = arith.constant 0 : index
    %14 = vector.load %arg4[%c0_5, %c0_6] : memref<1x128xf32, #tpu.memory_space<vmem>>, vector<1x128xf32>
    %15 = vector.broadcast %13 : f32 to vector<1x128xf32>
    %16 = arith.mulf %15, %14 : vector<1x128xf32>
    %17 = arith.mulf %16, %12 : vector<1x128xf32>
    %c0_7 = arith.constant 0 : index
    %c0_8 = arith.constant 0 : index
    %18 = vector.load %arg5[%c0_7, %c0_8] : memref<1x128xf32, #tpu.memory_space<vmem>>, vector<1x128xf32>
    tpu.vector_store %arg5[%c0_7, %c0_8], %17 {strides = array<i32>} : memref<1x128xf32, #tpu.memory_space<vmem>>, vector<1x128xf32>,
    return
  }
  func.func @transform_0(%arg0: i32) -> i32 {
    %c0_i32 = arith.constant 0 : i32
    %c0_i32_0 = arith.constant 0 : i32
    return %c0_i32 : i32
  }
  func.func @transform_1(%arg0: i32) -> (i32, i32) {
    %c0_i32 = arith.constant 0 : i32
    %c0_i32_0 = arith.constant 0 : i32
    return %arg0, %c0_i32 : i32, i32
  }
  func.func @transform_2(%arg0: i32) -> (i32, i32) {
    %c0_i32 = arith.constant 0 : i32
    %c0_i32_0 = arith.constant 0 : i32
    %c0_i32_1 = arith.constant 0 : i32
    return %c0_i32, %c0_i32_0 : i32, i32
  }
  func.func @transform_3(%arg0: i32) -> (i32, i32) {
    %c0_i32 = arith.constant 0 : i32
    %c0_i32_0 = arith.constant 0 : i32
    return %c0_i32, %arg0 : i32, i32
  }
  func.func @transform_4(%arg0: i32) -> (i32, i32) {
    %c0_i32 = arith.constant 0 : i32
    %c0_i32_0 = arith.constant 0 : i32
    return %c0_i32, %arg0 : i32, i32
  }
}

</mosaic_0001>

<bundles_post_ra>
// kernel: tpu_custom_call.1
= control target key start
LH: loop header
LB: loop body
LE: loop exit
PB: predicated region body
PF: predicated region fallthrough
CT: control target
= control target key end

     0   :  { %9 = vsyncpa [#allocation5], 0  ;;  %s399_s0 = inlined_call_operand.hbm [shape: f32[3], index: 0, kind: input, shape index: {}]   ;;  %s400_s1 = inlined_call_operand.hbm [shape: bf16[8,32], index: 1, kind: input, shape index: {}]   ;;  %s401_s2 = inlined_call_operand.vmem [shape: bf16[1,32], index: 2, kind: input, shape index: {}]   ;;  %s402_s3 = inlined_call_operand.vmem [shape: f32[1,8], index: 3, kind: input, shape index: {}]   ;;  %s403_s4 = inlined_call_operand.hbm [shape: f32[1,8], index: 4, kind: output, shape index: {}]  }
   0x1   :  { %10 = vsyncpa [#allocation3], 0 }
   0x2   :  { %11 = vsyncpa [#allocation4], 0  ;;  %s256_s17 = scalar_lea.hbm %s399_s0, 16 }
   0x3   :  { %p257_p0 = scmp.ne.s32.totalorder %s399_s0, %s256_s17  ;;  %p260_p1 = scmp.lt.u32.totalorder %s256_s17, %s399_s0 }
   0x5   :  { %p262_p2 = pnand %p260_p1, %p257_p0 }
   0x7   :  { %265 = shalt.err (!%p262_p2)
}
   0x8   :  { %s316_s22 = smov [#allocation2]  }
   0x9   :  { %19 = dma.hbm_to_smem %s399_s0, 16, %s316_s22, [#allocation5]  }
   0xa   :  { %24 = vsyncadd [#allocation3], 960  ;;  %s317_s25 = smov [#allocation6]   ;;  %s266_s29 = scalar_lea.hbm %s400_s1, 64 }
   0xb   :  { %s25_s26 = sshll.u32 %s317_s25, 4  ;;  %p267_p3 = scmp.ne.s32.totalorder %s400_s1, %s266_s29  ;;  %s26_s26 = int_to_ptr.vmem [resolvable:$true] %s25_s26 }
   0xc   :  { %p270_p4 = scmp.lt.u32.totalorder %s266_s29, %s400_s1 }
   0xe   :  { %p272_p5 = pnand %p270_p4, %p267_p3 }
  0x10   :  { %275 = shalt.err (!%p272_p5)
}
  0x11   :  { %s276_s8 = scalar_lea.vmem %s26_s26, 64  ;;  %s280_s0 = scalar_lea.vmem %s26_s26, 1024 }
  0x12   :  { %p277_p6 = scmp.ne.s32.totalorder %s26_s26, %s276_s8  ;;  %p281_p7 = scmp.lt.s32.totalorder %s26_s26, %s26_s26 }
  0x13   :  { %p282_p8 = scmp.lt.s32.totalorder %s280_s0, %s276_s8 }
  0x15   :  { %p283_p9 = por %p282_p8, %p281_p7 }
  0x17   :  { %p284_p10 = pnand %p283_p9, %p277_p6 }
  0x19   :  { %287 = shalt.err (!%p284_p10)
}
  0x1a   :  { %s318_s9 = smov 64   ;;  %s319_s10 = smov 4  }
  0x1b   :  { %31 = dma.hbm_to_vmem [thread:$0]  %s400_s1, 64, %s26_s26, [#allocation3], %s318_s9, %s318_s9, %s319_s10  }
  0x1c   :  { %310 = dma.done.wait [#allocation5], 16  }
  0x1d   :  { %311 = vsyncadd [#allocation5], 4294967280 }
  0x1e   :  { %312 = dma.done.wait [#allocation3], 1024  }
  0x1f   :  { %313 = vsyncadd [#allocation3], 4294966272 }
  0x20   :  { %42 = sfence }
  0x21   :  { %v246_v0 = vld [vmem:[#allocation6] sm:$0xff]   ;;  %v320_v1 = vmov 0.0   ;;  %vm105_vm0 = vcmask 261120   ;;  %v247_v3 = vld [vmem:[#allocation6 + $0x8] sm:$0xff]   ;;  %vm321_vm1 = vmmov 0   ;;  %v248_v5 = vld [vmem:[#allocation6 + $0x10] sm:$0xff]  }
  0x22   :  { %219 = vmatprep.subr.bf16.mxu0 %v320_v1  ;;  %v110_v2 = vsel %vm105_vm0, %v246_v0, 0  ;;  %v113_v4 = vsel %vm105_vm0, %v247_v3, 0  ;;  %235 = vmatprep.mubr.msk.bf16.mxu0 %vm321_vm1, %v320_v1  ;;  %v116_v6 = vsel %vm105_vm0, %v248_v5, 0  ;;  %v249_v7 = vld [vmem:[#allocation6 + $0x18] sm:$0xff]   ;;  %v250_v9 = vld [vmem:[#allocation6 + $0x20] sm:$0xff]   ;;  %v251_v11 = vld [vmem:[#allocation6 + $0x28] sm:$0xff]  }
  0x23   :  { %220 = vmatpush3.bf16.xpose.msra.mxu0 %v110_v2  ;;  %v119_v8 = vsel %vm105_vm0, %v249_v7, 0  ;;  %v122_v10 = vsel %vm105_vm0, %v250_v9, 0  ;;  %v125_v12 = vsel %vm105_vm0, %v251_v11, 0  ;;  %v252_v13 = vld [vmem:[#allocation6 + $0x30] sm:$0xff]   ;;  %v253_v15 = vld [vmem:[#allocation6 + $0x38] sm:$0xff]   ;;  %s199_s14 = sld [smem:[#allocation2 + $0x1]] }
  0x24   :  { %221 = vmatprep.subr.bf16.mxu0 %v320_v1  ;;  %v128_v14 = vsel %vm105_vm0, %v252_v13, 0  ;;  %v131_v16 = vsel %vm105_vm0, %v253_v15, 0  ;;  %v63_v17 = vld [vmem:[%s401_s2] sm:$0x1]  ;;  %s44_s15 = sld [smem:[#allocation2]]  ;;  %s200_s16 = sld [smem:[#allocation2 + $0x2]] }
  0x25   :  { %v178_v25 = vld [vmem:[%s402_s3] sm:$0x1]  ;;  %s322_s2 = smov [#allocation7]  }
  0x26   :  { %s189_s20 = sshll.u32 %s322_s2, 4  ;;  %s190_s20 = int_to_ptr.vmem [resolvable:$true] %s189_s20 }
  0x27   :  { %s288_s21 = scalar_lea.vmem %s190_s20, 16  ;;  %s292_s22 = scalar_lea.vmem %s190_s20, 32 }
  0x28   :  { %p289_p11 = scmp.ne.s32.totalorder %s190_s20, %s288_s21  ;;  %p293_p12 = scmp.lt.s32.totalorder %s190_s20, %s190_s20 }
  0x29   :  { %v64_v18 = vstv %s199_s14  ;;  %p294_p13 = scmp.lt.s32.totalorder %s292_s22, %s288_s21 }
  0x2a   :  { %s177_s17 = sand.u32 2147483647, %s44_s15  ;;  %v174_v24 = vstv %s200_s16 }
  0x2b   :  { %222 = vmatpush3.bf16.xpose.msra.mxu0 %v113_v4  ;;  %v179_v26 = vstv %s177_s17  ;;  %p295_p0 = por %p294_p13, %p293_p12 }
  0x2c   :  { %223 = vmatprep.subr.bf16.mxu0 %v320_v1  ;;  %v180_v29 = vmul.f32 %v179_v26, %v178_v25 }
  0x2d   :  { %p296_p1 = pnand %p295_p0, %p289_p11 }
  0x33   :  { %224 = vmatpush3.bf16.xpose.msra.mxu0 %v116_v6 }
  0x34   :  { %225 = vmatprep.subr.bf16.mxu0 %v320_v1 }
  0x3b   :  { %226 = vmatpush3.bf16.xpose.msra.mxu0 %v119_v8 }
  0x3c   :  { %227 = vmatprep.subr.bf16.mxu0 %v320_v1 }
  0x43   :  { %228 = vmatpush3.bf16.xpose.msra.mxu0 %v122_v10 }
  0x44   :  { %229 = vmatprep.subr.bf16.mxu0 %v320_v1 }
  0x4b   :  { %230 = vmatpush3.bf16.xpose.msra.mxu0 %v125_v12 }
  0x4c   :  { %231 = vmatprep.subr.bf16.mxu0 %v320_v1 }
  0x53   :  { %232 = vmatpush3.bf16.xpose.msra.mxu0 %v128_v14 }
  0x54   :  { %233 = vmatprep.subr.bf16.mxu0 %v320_v1 }
  0x5b   :  { %234 = vmatpush3.bf16.xpose.msra.mxu0 %v131_v16 }
  0x62   :  { %236 = vmatmul.mubr.msk.bf16.vlgmr.msra.gmra.mrb[0].mxu0 %vm105_vm0, %v63_v17 }
 0x135   :  { %v167_v19 = vpop.f32.mrb[0].mxu0 }
 0x136   :  { %v168_v20 = vadd.f32 %v167_v19, %v64_v18  ;;  %v237_v21 = vpop.f32.mrb[1].mxu0 }
 0x137   :  { %v170_v22 = vpop.f32.mrb[2].mxu0 }
 0x138   :  { %254 = vtanh.f32 %v168_v20  ;;  %v238_v23 = vpop.f32.mrb[3].mxu0 }
 0x142   :  { %v255_v27 = vpop.eup %254 }
 0x143   :  { %v175_v28 = vmul.f32 %v255_v27, %v174_v24 }
 0x145   :  { %v176_v30 = vadd.f32 1.0, %v175_v28 }
 0x147   :  { %v181_v31 = vmul.f32 %v180_v29, %v176_v30 }
 0x149   :  { %182 = vst [vmem:[#allocation7] sm:$0x1] %v181_v31 }
 0x14a   :  { %299 = shalt.err (!%p296_p1)
}
 0x14b   :  { %s300_s24 = scalar_lea.hbm %s403_s4, 16 }
 0x14c   :  { %p301_p2 = scmp.ne.s32.totalorder %s403_s4, %s300_s24  ;;  %p304_p3 = scmp.lt.u32.totalorder %s300_s24, %s403_s4 }
 0x14e   :  { %p306_p4 = pnand %p304_p3, %p301_p2 }
 0x150   :  { %309 = shalt.err (!%p306_p4)
}
 0x151   :  { %192 = dma.vmem_to_hbm [thread:$0]  %s190_s20, 16, %s403_s4, [#allocation4]  }
 0x152   :  { %314 = dma.done.wait [#allocation4], 16  }
 0x153   :  { %315 = vsyncadd [#allocation4], 4294967280 }
 0x154   :  { %196 = vsyncpa [#allocation3], 1 }
 0x155   :  { %197 = vsyncpa [#allocation4], 1 }
 0x156   :  { %198 = vsyncpa [#allocation5], 1 }

</bundles_post_ra>
